<compile_context>
chip_gen: v5e
topology: v5e:2x2
jax: 0.10.0
libtpu: 0.0.40
codegen_flags: <defaults>
</compile_context>

<pallas_src>
import functools

import jax
import jax.numpy as jnp
from jax import lax
from jax.experimental import pallas as pl
from jax.experimental.pallas import tpu as pltpu


def _contrast_loss_kernel(fx_ref, fyn_ref, lab_row_ref, lab_col_ref,
                          loss_ref, cnt_ref, *, temperature,
                          scale_by_temperature, batch_size, bf16_exp):
    """One row-tile of the supervised contrastive loss.

    fx_ref      : (TQ, D) raw featurex rows (padded rows are zero).
    fyn_ref     : (D, B)  bf16, already L2-normalized featurey^T (resident).
    lab_row_ref : (1, B)  int32 labels (resident).
    lab_col_ref : (TQ, 1) int32 labels for this row tile (sentinel in padding).
    loss_ref    : (TQ, 1) per-row loss contribution (0 for invalid rows).
    cnt_ref     : (TQ, 1) per-row validity flag (1.0 / 0.0).
    """
    i = pl.program_id(0)
    TQ = fx_ref.shape[0]
    B = fyn_ref.shape[1]

    eps2 = jnp.float32(1e-24)          # (1e-12)^2, matches F.normalize eps

    # Normalize the streamed query rows; fold 1/temperature into the same
    # per-row scale (one EUP rsqrt + one VPU mul, applied once per row).
    fx = fx_ref[...].astype(jnp.float32)                              # (TQ, D)
    inv_norm = lax.rsqrt(jnp.maximum(
        jnp.sum(fx * fx, axis=1, keepdims=True), eps2))               # (TQ, 1)
    fx_n = (fx * (inv_norm * jnp.float32(1.0 / temperature))).astype(jnp.bfloat16)

    # anchor_dot_contrast (temperature already folded in): bf16 MXU, f32 acc.
    adc = jnp.dot(fx_n, fyn_ref[...],
                  preferred_element_type=jnp.float32)                 # (TQ, B)
    logits = adc - jnp.max(adc, axis=1, keepdims=True)                # (TQ, B)

    # Fused mask algebra: boolean masks + jnp.where, no float eye / (mask-eye)
    # / (1-eye) temporaries or extra (TQ,B) multiplies.
    row_ids = i * TQ + lax.broadcasted_iota(jnp.int32, (TQ, B), 0)
    col_ids = lax.broadcasted_iota(jnp.int32, (TQ, B), 1)
    is_diag = row_ids == col_ids                                      # (TQ, B)
    mask_b = lab_row_ref[...] == lab_col_ref[...]                     # (TQ, B)
    pos_b = jnp.logical_and(mask_b, jnp.logical_not(is_diag))

    if bf16_exp:
        # EUP-bound configs on v6e/v7x only; denominator accumulated in f32.
        exp_l = jnp.exp(logits.astype(jnp.bfloat16))
        denom = jnp.sum(jnp.where(is_diag, jnp.bfloat16(0), exp_l),
                        axis=1, keepdims=True, dtype=jnp.float32)     # (TQ, 1)
    else:
        exp_l = jnp.exp(logits)
        denom = jnp.sum(jnp.where(is_diag, 0.0, exp_l),
                        axis=1, keepdims=True)                        # (TQ, 1)

    # Diagonal always matches for real rows -> num_pos = rowsum(mask) - 1.
    num_pos = jnp.sum(mask_b.astype(jnp.float32), axis=1, keepdims=True) - 1.0
    # sum(log_probs*pos) = sum(logits*pos) - num_pos*log(denom); log_probs is
    # never materialized.
    sum_pos_logits = jnp.sum(jnp.where(pos_b, logits, 0.0),
                             axis=1, keepdims=True)
    sum_pos_logprob = sum_pos_logits - num_pos * jnp.log(denom)

    # Rows that really exist (padding) and have at least one positive.
    grow = i * TQ + lax.broadcasted_iota(jnp.int32, (TQ, 1), 0)
    valid = jnp.logical_and(num_pos > 0.0, grow < batch_size)
    validf = valid.astype(jnp.float32)
    safe_num = jnp.where(valid, num_pos, 1.0)

    loss_rows = -(sum_pos_logprob / safe_num) * validf                # (TQ, 1)
    if scale_by_temperature:
        loss_rows = loss_rows * jnp.float32(temperature)

    loss_ref[...] = loss_rows
    cnt_ref[...] = validf


def _round_up(x, m):
    return -(-x // m) * m


def _pick_row_tile(B, D, fx_itemsize, vmem_budget_bytes, sublane):
    """Largest row tile (multiple of `sublane`, capped at 512) whose estimated
    VMEM footprint (resident fy^T + fx tile + live (TQ,B) temporaries) fits."""
    resident = 2 * (D * B * 2) + 2 * (B * 4)     # fy^T (bf16, x2 bufs) + labels
    tq = _round_up(min(max(B, sublane), 512), sublane)
    while tq > sublane:
        tmp = (8 * tq * B * 4                    # live (TQ,B) f32/bool temps
               + 2 * tq * D * fx_itemsize        # fx tile, double-buffered
               + 8 * tq * 4)                     # row labels + per-row outputs
        if resident + tmp <= vmem_budget_bytes:
            break
        tq -= sublane
    return max(tq, sublane)


def contrast_loss(featurex, featurey, label, *, temperature=0.5,
                  scale_by_temperature=True, bf16_exp=False,
                  max_row_tile=None, vmem_budget_bytes=28 * 2**20):
    """Pallas implementation of ContrastLoss.forward.

    featurex, featurey: float [B, D]; label: int sequence/array of length B.
    """
    featurex = jnp.asarray(featurex)
    featurey = jnp.asarray(featurey)
    B, D = featurex.shape
    assert featurey.shape == (B, D)
    label = jnp.asarray(label, dtype=jnp.int32).reshape(-1)
    if label.shape[0] != B:
        return jnp.float32(0.0)      # mirrors the PyTorch early "return 0"

    # featurey is reused by every row tile, so its L2 normalization is hoisted
    # out of the kernel: a single O(B*D) f32 pass here instead of once per
    # grid step (and no @pl.when(i==0) scratch fill that would serialize the
    # grid axis).  bf16 (D, B) resident MXU operand.
    fy = featurey.astype(jnp.float32)
    fy_n = fy * lax.rsqrt(jnp.maximum(
        jnp.sum(fy * fy, axis=1, keepdims=True), 1e-24))
    fy_t = fy_n.T.astype(jnp.bfloat16)                        # (D, B)

    sublane = 8 if featurex.dtype.itemsize >= 4 else 16       # bf16 row packing
    tq = _pick_row_tile(B, D, featurex.dtype.itemsize, vmem_budget_bytes,
                        sublane)
    if max_row_tile is not None:
        tq = min(tq, _round_up(int(max_row_tile), sublane))
    num_tiles = -(-B // tq)
    b_pad = num_tiles * tq

    fx = featurex
    lab_col = label.reshape(B, 1)
    if b_pad != B:
        pad = b_pad - B
        fx = jnp.pad(fx, ((0, pad), (0, 0)))
        lab_col = jnp.pad(lab_col, ((0, pad), (0, 0)),
                          constant_values=jnp.iinfo(jnp.int32).min)
    lab_row = label.reshape(1, B)

    kernel = functools.partial(_contrast_loss_kernel,
                               temperature=float(temperature),
                               scale_by_temperature=bool(scale_by_temperature),
                               batch_size=B, bf16_exp=bool(bf16_exp))

    # Explicit scoped-VMEM limit sized from the same estimate used for tq.
    est = (2 * D * B * 2 + 2 * B * 4 + 8 * tq * B * 4
           + 2 * tq * D * featurex.dtype.itemsize + 8 * tq * 4)
    vmem_limit = int(min(max(est + (4 << 20), 16 << 20), 48 << 20))

    grid_spec = pltpu.PrefetchScalarGridSpec(
        num_scalar_prefetch=0,
        grid=(num_tiles,),
        in_specs=[
            pl.BlockSpec((tq, D), lambda i: (i, 0)),   # featurex row tile
            pl.BlockSpec((D, B), lambda i: (0, 0)),    # normalized featurey^T (resident)
            pl.BlockSpec((1, B), lambda i: (0, 0)),    # labels as row (resident)
            pl.BlockSpec((tq, 1), lambda i: (i, 0)),   # labels for this row tile
        ],
        out_specs=[
            pl.BlockSpec((tq, 1), lambda i: (i, 0)),   # per-row loss partial
            pl.BlockSpec((tq, 1), lambda i: (i, 0)),   # per-row validity flag
        ],
    )

    loss_rows, valid_rows = pl.pallas_call(
        kernel,
        out_shape=(jax.ShapeDtypeStruct((b_pad, 1), jnp.float32),
                   jax.ShapeDtypeStruct((b_pad, 1), jnp.float32)),
        grid_spec=grid_spec,
        compiler_params=pltpu.CompilerParams(
            # No cross-iteration state -> the row axis can be split across
            # TensorCores (v7x megacore); neutral on single-TC v5e/v6e.
            dimension_semantics=("parallel",),
            vmem_limit_bytes=vmem_limit),
        cost_estimate=pl.CostEstimate(
            flops=2 * b_pad * B * D + 12 * b_pad * B,
            transcendentals=b_pad * B + 2 * b_pad,
            bytes_accessed=(b_pad * D * featurex.dtype.itemsize
                            + D * B * 2 + (B + b_pad) * 4 + 2 * b_pad * 4)),
    )(fx, fy_t, lab_row, lab_col)

    # Mean over rows with at least one positive.  NOTE: if every label is
    # unique the valid count is 0 and this is NaN — identical to the PyTorch
    # reference (mean of an empty tensor).
    return jnp.sum(loss_rows) / jnp.sum(valid_rows)


def _contrast_loss_ref(featurex, featurey, label, *, temperature=0.5,
                       scale_by_temperature=True):
    # Pure-JAX reference mirroring the PyTorch code (for a sanity check).
    B = featurex.shape[0]
    eps = 1e-12
    fx = featurex / jnp.maximum(
        jnp.linalg.norm(featurex, axis=1, keepdims=True), eps)
    fy = featurey / jnp.maximum(
        jnp.linalg.norm(featurey, axis=1, keepdims=True), eps)
    labels = jnp.asarray(label).reshape(1, -1)
    mask = (labels == labels.T).astype(jnp.float32)
    adc = (fx @ fy.T) / temperature
    logits = adc - jnp.max(adc, axis=1, keepdims=True)
    exp_logits = jnp.exp(logits)
    logits_mask = 1.0 - jnp.eye(B)
    pos = mask * logits_mask
    neg = 1.0 - mask
    npos = jnp.sum(pos, axis=1)
    denom = (jnp.sum(exp_logits * neg, axis=1, keepdims=True)
             + jnp.sum(exp_logits * pos, axis=1, keepdims=True))
    log_probs = logits - jnp.log(denom)
    row = jnp.sum(log_probs * pos, axis=1)
    valid = npos > 0
    per_row = jnp.where(valid, row / jnp.where(valid, npos, 1.0), 0.0)
    loss = -per_row
    if scale_by_temperature:
        loss = loss * temperature
    return jnp.sum(loss * valid) / jnp.sum(valid)


if __name__ == "__main__":
    key = jax.random.PRNGKey(0)

    # Case 1: single tile (B=8, D=32). Repeated classes + one singleton class
    # (exercises the num_positives > 0 filtering).
    B, D = 8, 32
    kx, ky, kk = jax.random.split(key, 3)
    featurex = jax.random.normal(kx, (B, D), dtype=jnp.float32)
    featurey = jax.random.normal(ky, (B, D), dtype=jnp.float32)
    label = jnp.array([0, 1, 0, 1, 2, 2, 0, 3], dtype=jnp.int32)

    loss = contrast_loss(featurex, featurey, label,
                         temperature=0.5, scale_by_temperature=True)
    loss = jax.block_until_ready(loss)
    ref = _contrast_loss_ref(featurex, featurey, label,
                             temperature=0.5, scale_by_temperature=True)
    # bf16 MXU operands => slightly looser tolerance than a pure-f32 check.
    assert jnp.allclose(loss, ref, rtol=3e-2, atol=3e-2), (loss, ref)

    # Case 2: multi-tile parallel grid with row padding
    # (B=20, max_row_tile=8 -> 3 tiles, 4 padded rows masked out of the mean).
    B2, D2 = 20, 32
    k1, k2, k3 = jax.random.split(kk, 3)
    fx2 = jax.random.normal(k1, (B2, D2), dtype=jnp.float32)
    fy2 = jax.random.normal(k2, (B2, D2), dtype=jnp.float32)
    lab2 = jax.random.randint(k3, (B2,), 0, 5, dtype=jnp.int32)

    loss2 = contrast_loss(fx2, fy2, lab2, temperature=0.5,
                          scale_by_temperature=True, max_row_tile=8)
    loss2 = jax.block_until_ready(loss2)
    ref2 = _contrast_loss_ref(fx2, fy2, lab2, temperature=0.5,
                              scale_by_temperature=True)
    assert jnp.allclose(loss2, ref2, rtol=3e-2, atol=3e-2), (loss2, ref2)

    print("KERNEL_OK")
</pallas_src>

<mosaic_0001>
module attributes {stable_mosaic.version = 11 : i64} {
  func.func @_contrast_loss_kernel(%arg0: i32, %arg1: memref<8x32xf32, #tpu.memory_space<vmem>>, %arg2: memref<32x8xbf16, #tpu.memory_space<vmem>>, %arg3: memref<1x8xi32, #tpu.memory_space<vmem>>, %arg4: memref<8x1xi32, #tpu.memory_space<vmem>>, %arg5: memref<8x1xf32, #tpu.memory_space<vmem>>, %arg6: memref<8x1xf32, #tpu.memory_space<vmem>>) attributes {dimension_semantics = [#tpu.dimension_semantics<parallel>], iteration_bounds = array<i64: 1>, scalar_prefetch = 0 : i64, scratch_operands = 0 : i64, tpu.core_type = #tpu.core_type<tc>, window_params = [{transform_indices = @transform_0, window_bounds = array<i64: 8, 32>}, {pipeline_mode = #tpu.pipeline_mode<synchronous>, transform_indices = @transform_1, window_bounds = array<i64: 32, 8>}, {pipeline_mode = #tpu.pipeline_mode<synchronous>, transform_indices = @transform_2, window_bounds = array<i64: 1, 8>}, {transform_indices = @transform_3, window_bounds = array<i64: 8, 1>}, {transform_indices = @transform_4, window_bounds = array<i64: 8, 1>}, {transform_indices = @transform_5, window_bounds = array<i64: 8, 1>}]} {
    %c0 = arith.constant 0 : index
    %c0_0 = arith.constant 0 : index
    %0 = vector.load %arg1[%c0, %c0_0] : memref<8x32xf32, #tpu.memory_space<vmem>>, vector<8x32xf32>
    %1 = arith.mulf %0, %0 : vector<8x32xf32>
    %cst = arith.constant dense<0.000000e+00> : vector<8xf32>
    %2 = vector.multi_reduction <add>, %1, %cst [1] : vector<8x32xf32> to vector<8xf32>
    %3 = vector.shape_cast %2 : vector<8xf32> to vector<8x1xf32>
    %cst_1 = arith.constant 1.000000e-24 : f32
    %4 = vector.broadcast %cst_1 : f32 to vector<8x1xf32>
    %5 = arith.maximumf %3, %4 : vector<8x1xf32>
    %6 = math.rsqrt %5 : vector<8x1xf32>
    %cst_2 = arith.constant 2.000000e+00 : f32
    %7 = vector.broadcast %cst_2 : f32 to vector<8x1xf32>
    %8 = arith.mulf %6, %7 : vector<8x1xf32>
    %9 = vector.broadcast %8 : vector<8x1xf32> to vector<8x32xf32>
    %10 = arith.mulf %0, %9 : vector<8x32xf32>
    %11 = arith.truncf %10 : vector<8x32xf32> to vector<8x32xbf16>
    %c0_3 = arith.constant 0 : index
    %c0_4 = arith.constant 0 : index
    %12 = vector.load %arg2[%c0_3, %c0_4] : memref<32x8xbf16, #tpu.memory_space<vmem>>, vector<32x8xbf16>
    %cst_5 = arith.constant dense<0.000000e+00> : vector<8x8xf32>
    %13 = tpu.matmul %11, %12, %cst_5 {dimension_numbers = #tpu.dot_dimension_numbers<[1], [0], [0], [1], [0, 0, 1, 1], [], []>} : vector<8x32xbf16>, vector<32x8xbf16>, vector<8x8xf32> -> vector<8x8xf32>
    %cst_6 = arith.constant dense<0xFF800000> : vector<8xf32>
    %14 = vector.multi_reduction <maximumf>, %13, %cst_6 [1] : vector<8x8xf32> to vector<8xf32>
    %15 = vector.shape_cast %14 : vector<8xf32> to vector<8x1xf32>
    %16 = vector.broadcast %15 : vector<8x1xf32> to vector<8x8xf32>
    %17 = arith.subf %13, %16 : vector<8x8xf32>
    %c8_i32 = arith.constant 8 : i32
    %18 = arith.muli %arg0, %c8_i32 : i32
    %19 = tpu.iota {dimensions = array<i32: 0>} : vector<8x8xi32>
    %20 = vector.broadcast %18 : i32 to vector<8x8xi32>
    %21 = arith.addi %20, %19 : vector<8x8xi32>
    %22 = tpu.iota {dimensions = array<i32: 1>} : vector<8x8xi32>
    %23 = arith.cmpi eq, %21, %22 : vector<8x8xi32>
    %c0_7 = arith.constant 0 : index
    %c0_8 = arith.constant 0 : index
    %24 = vector.load %arg3[%c0_7, %c0_8] : memref<1x8xi32, #tpu.memory_space<vmem>>, vector<1x8xi32>
    %c0_9 = arith.constant 0 : index
    %c0_10 = arith.constant 0 : index
    %25 = vector.load %arg4[%c0_9, %c0_10] : memref<8x1xi32, #tpu.memory_space<vmem>>, vector<8x1xi32>
    %26 = vector.broadcast %24 : vector<1x8xi32> to vector<8x8xi32>
    %27 = vector.broadcast %25 : vector<8x1xi32> to vector<8x8xi32>
    %28 = arith.cmpi eq, %26, %27 : vector<8x8xi32>
    %cst_11 = arith.constant dense<true> : vector<8x8xi1>
    %29 = arith.xori %23, %cst_11 : vector<8x8xi1>
    %30 = arith.andi %28, %29 : vector<8x8xi1>
    %31 = math.exp %17 : vector<8x8xf32>
    %cst_12 = arith.constant 0.000000e+00 : f32
    %32 = vector.broadcast %cst_12 : f32 to vector<8x8xf32>
    %33 = arith.select %23, %32, %31 : vector<8x8xi1>, vector<8x8xf32>
    %cst_13 = arith.constant dense<0.000000e+00> : vector<8xf32>
    %34 = vector.multi_reduction <add>, %33, %cst_13 [1] : vector<8x8xf32> to vector<8xf32>
    %35 = vector.shape_cast %34 : vector<8xf32> to vector<8x1xf32>
    %36 = arith.extui %28 : vector<8x8xi1> to vector<8x8xi32>
    %37 = arith.sitofp %36 : vector<8x8xi32> to vector<8x8xf32>
    %cst_14 = arith.constant dense<0.000000e+00> : vector<8xf32>
    %38 = vector.multi_reduction <add>, %37, %cst_14 [1] : vector<8x8xf32> to vector<8xf32>
    %39 = vector.shape_cast %38 : vector<8xf32> to vector<8x1xf32>
    %cst_15 = arith.constant 1.000000e+00 : f32
    %40 = vector.broadcast %cst_15 : f32 to vector<8x1xf32>
    %41 = arith.subf %39, %40 : vector<8x1xf32>
    %cst_16 = arith.constant 0.000000e+00 : f32
    %42 = vector.broadcast %cst_16 : f32 to vector<8x8xf32>
    %43 = arith.select %30, %17, %42 : vector<8x8xi1>, vector<8x8xf32>
    %cst_17 = arith.constant dense<0.000000e+00> : vector<8xf32>
    %44 = vector.multi_reduction <add>, %43, %cst_17 [1] : vector<8x8xf32> to vector<8xf32>
    %45 = vector.shape_cast %44 : vector<8xf32> to vector<8x1xf32>
    %46 = math.log %35 : vector<8x1xf32>
    %47 = arith.mulf %41, %46 : vector<8x1xf32>
    %48 = arith.subf %45, %47 : vector<8x1xf32>
    %c8_i32_18 = arith.constant 8 : i32
    %49 = arith.muli %arg0, %c8_i32_18 : i32
    %50 = tpu.iota {dimensions = array<i32: 0>} : vector<8x1xi32>
    %51 = vector.broadcast %49 : i32 to vector<8x1xi32>
    %52 = arith.addi %51, %50 : vector<8x1xi32>
    %cst_19 = arith.constant 0.000000e+00 : f32
    %53 = vector.broadcast %cst_19 : f32 to vector<8x1xf32>
    %54 = arith.cmpf ogt, %41, %53 : vector<8x1xf32>
    %c8_i32_20 = arith.constant 8 : i32
    %55 = vector.broadcast %c8_i32_20 : i32 to vector<8x1xi32>
    %56 = arith.cmpi slt, %52, %55 : vector<8x1xi32>
    %57 = arith.andi %54, %56 : vector<8x1xi1>
    %58 = arith.extui %57 : vector<8x1xi1> to vector<8x1xi32>
    %59 = arith.sitofp %58 : vector<8x1xi32> to vector<8x1xf32>
    %cst_21 = arith.constant 1.000000e+00 : f32
    %60 = vector.broadcast %cst_21 : f32 to vector<8x1xf32>
    %61 = arith.select %57, %41, %60 : vector<8x1xi1>, vector<8x1xf32>
    %62 = arith.divf %48, %61 : vector<8x1xf32>
    %cst_22 = arith.constant 0.000000e+00 : f32
    %63 = vector.broadcast %cst_22 : f32 to vector<8x1xf32>
    %64 = arith.subf %63, %62 : vector<8x1xf32>
    %65 = arith.mulf %64, %59 : vector<8x1xf32>
    %cst_23 = arith.constant 5.000000e-01 : f32
    %66 = vector.broadcast %cst_23 : f32 to vector<8x1xf32>
    %67 = arith.mulf %65, %66 : vector<8x1xf32>
    %c0_24 = arith.constant 0 : index
    %c0_25 = arith.constant 0 : index
    %68 = vector.load %arg5[%c0_24, %c0_25] : memref<8x1xf32, #tpu.memory_space<vmem>>, vector<8x1xf32>
    tpu.vector_store %arg5[%c0_24, %c0_25], %67 {strides = array<i32>} : memref<8x1xf32, #tpu.memory_space<vmem>>, vector<8x1xf32>,
    %c0_26 = arith.constant 0 : index
    %c0_27 = arith.constant 0 : index
    %69 = vector.load %arg6[%c0_26, %c0_27] : memref<8x1xf32, #tpu.memory_space<vmem>>, vector<8x1xf32>
    tpu.vector_store %arg6[%c0_26, %c0_27], %59 {strides = array<i32>} : memref<8x1xf32, #tpu.memory_space<vmem>>, vector<8x1xf32>,
    return
  }
  func.func @transform_0(%arg0: i32) -> (i32, i32) {
    %c0_i32 = arith.constant 0 : i32
    %c0_i32_0 = arith.constant 0 : i32
    return %arg0, %c0_i32 : i32, i32
  }
  func.func @transform_1(%arg0: i32) -> (i32, i32) {
    %c0_i32 = arith.constant 0 : i32
    %c0_i32_0 = arith.constant 0 : i32
    %c0_i32_1 = arith.constant 0 : i32
    return %c0_i32, %c0_i32_0 : i32, i32
  }
  func.func @transform_2(%arg0: i32) -> (i32, i32) {
    %c0_i32 = arith.constant 0 : i32
    %c0_i32_0 = arith.constant 0 : i32
    %c0_i32_1 = arith.constant 0 : i32
    return %c0_i32, %c0_i32_0 : i32, i32
  }
  func.func @transform_3(%arg0: i32) -> (i32, i32) {
    %c0_i32 = arith.constant 0 : i32
    %c0_i32_0 = arith.constant 0 : i32
    return %arg0, %c0_i32 : i32, i32
  }
  func.func @transform_4(%arg0: i32) -> (i32, i32) {
    %c0_i32 = arith.constant 0 : i32
    %c0_i32_0 = arith.constant 0 : i32
    return %arg0, %c0_i32 : i32, i32
  }
  func.func @transform_5(%arg0: i32) -> (i32, i32) {
    %c0_i32 = arith.constant 0 : i32
    %c0_i32_0 = arith.constant 0 : i32
    return %arg0, %c0_i32 : i32, i32
  }
}

</mosaic_0001>

<bundles_post_ra>
// kernel: tpu_custom_call.1
= control target key start
LH: loop header
LB: loop body
LE: loop exit
PB: predicated region body
PF: predicated region fallthrough
CT: control target
= control target key end

     0   :  { %vm22_vm0 = vcmask 261120   ;;  %v177_v6 = vmov 0   ;;  %vm72_vm5 = vcmask 64512   ;;  %v178_v21 = vmov 0.0   ;;  %s243_s0 = inlined_call_operand.vmem [shape: f32[8,32], index: 0, kind: input, shape index: {}]   ;;  %s244_s1 = inlined_call_operand.vmem [shape: bf16[32,8], index: 1, kind: input, shape index: {}]   ;;  %s245_s3 = inlined_call_operand.vmem [shape: s32[8,1], index: 3, kind: input, shape index: {}]   ;;  %s246_s2 = inlined_call_operand.vmem [shape: s32[1,8], index: 2, kind: input, shape index: {}]   ;;  %s247_s5 = inlined_call_operand.vmem [shape: f32[8,1], index: 5, kind: output, shape index: {1}]   ;;  %s248_s4 = inlined_call_operand.vmem [shape: f32[8,1], index: 4, kind: output, shape index: {0}]  }
   0x1   :  { %v20_v0 = vld [vmem:[%s243_s0] sm:$0xff]  ;;  %v162_v3 = vld [vmem:[%s244_s1 + $0x8] sm:$0xff]  ;;  %166 = vset.pattern.permute.xlu1 %v177_v6  ;;  %167 = vset.pattern.permute.xlu0 %v177_v6  ;;  %vm138_vm6 = vcmask 7168   ;;  %v78_v31 = vlaneseq  ;;  %vm179_vm9 = vmmov 1  }
   0x2   :  { %v21_v1 = vmul.f32 %v20_v0, %v20_v0  ;;  %65 = vmatpush.bf16.msra.mxu0 %v162_v3  ;;  %v161_v4 = vld [vmem:[%s244_s1] sm:$0xff] }
   0x3   :  { %v86_v5 = vld [vmem:[%s245_s3] sm:$0xff]  ;;  %v79_v34 = vshrl.u32 %v78_v31, 7  ;;  %v83_v35 = vand.u32 127, %v78_v31 }
   0x4   :  { %v23_v2 = vsel %vm22_vm0, %v21_v1, 0.0  ;;  %89 = vperm.xlu1 %166, %v86_v5   ;;  %v168_v20 = vld [vmem:[%s246_s2] ss:$0 sm:$0xff] }
   0x5   :  { %24 = vadd.xlane.f32.xlu0 %v23_v2  ;;  %vm84_vm8 = vcmp.eq.s32.totalorder %v79_v34, %v83_v35 }
   0x6   :  { %66 = vmatpush.bf16.msra.mxu0 %v161_v4  ;;  %vm92_vm10 = vmxor %vm84_vm8, %vm179_vm9 }
  0x76   :  { %v90_v19 = vpop.permute.xlu1 %89 }
  0x77   :  { %vm91_vm4 = vcmp.eq.s32.totalorder %v168_v20, %v90_v19 }
  0x78   :  { %v25_v7 = vpop.xlane.xlu0 %24  ;;  %v158_v22 = vsel %vm91_vm4, 1.0, %v178_v21  ;;  %vm93_vm11 = vmand %vm91_vm4, %vm92_vm10 }
  0x79   :  { %v26_v8 = vmax.f32 %v25_v7, 1e-24  ;;  %v102_v23 = vsel %vm72_vm5, %v158_v22, 0.0 }
  0x7a   :  { %103 = vadd.xlane.f32.xlu1 %v102_v23 }
  0x7b   :  { %169 = vrsqrt.f32 %v26_v8  ;;  %vm33_vm2 = vweird.f32 %v26_v8 }
  0x81   :  { %v170_v9 = vpop.eup %169 }
  0x82   :  { %v28_v10 = vmul.f32 %v170_v9, %v26_v8  ;;  %vm34_vm1 = vweird.f32 %v170_v9 }
  0x83   :  { %vm35_vm3 = vmor %vm33_vm2, %vm34_vm1 }
  0x84   :  { %v29_v11 = vmul.f32 %v170_v9, %v28_v10 }
  0x86   :  { %v30_v12 = vmul.f32 0.5, %v29_v11 }
  0x88   :  { %v31_v13 = vsub.f32 1.5, %v30_v12 }
  0x8a   :  { %v32_v14 = vmul.f32 %v170_v9, %v31_v13 }
  0x8c   :  { %v36_v15 = vsel %vm35_vm3, %v170_v9, %v32_v14 }
  0x8d   :  { %v37_v16 = vmul.f32 2.0, %v36_v15 }
  0x8f   :  { %v38_v17 = vmul.f32 %v37_v16, %v20_v0 }
  0x91   :  { %v39_v18 = vpack.c.bf16 %v38_v17, %v38_v17 }
  0x93   :  { %157 = vmatmul.msk.bf16.vlgmr.msra.gmra.mxu0 %vm22_vm0, %v39_v18 }
  0xed   :  { %v104_v27 = vpop.xlane.xlu1 %103 }
  0xee   :  { %v159_v28 = vadd.f32 -1.0, %v104_v27 }
  0xf0   :  { %vm114_vm7 = vcmp.gt.f32.partialorder %v159_v28, 0.0 }
  0xf1   :  { %v160_v29 = vsel %vm114_vm7, 1.0, %v178_v21  ;;  %v119_v41 = vsel %vm114_vm7, %v159_v28, 1.0 }
  0xf2   :  { %140 = vst.msk [vmem:[%s247_s5] sm:$0xff] %vm138_vm6, %v160_v29  ;;  %vm125_vm12 = vweird.f32 %v119_v41  ;;  %v131_v47 = vand.u32 2147483648, %v119_v41  ;;  %v129_v49 = vand.u32 2147483647, %v119_v41 }
  0xf4   :  { %v132_v52 = vor.u32 1.1754944e-38, %v131_v47  ;;  %vm130_vm15 = vcmp.eq.f32.partialorder %v129_v49, 8.507059e+37 }
 0x110   :  { %v68_v24 = vpop.f32.mrf.mxu0 }
 0x111   :  { %v73_v25 = vsel %vm72_vm5, %v68_v24, -inf }
 0x112   :  { %74 = vmax.xlane.f32.xlu0 %v73_v25 }
 0x118   :  { %v70_v26 = vpop.f32.mrf.mxu0 }
 0x185   :  { %v75_v30 = vpop.xlane.xlu0 %74 }
 0x186   :  { %v76_v32 = vsub.f32 %v68_v24, %v75_v30 }
 0x188   :  { %v94_v33 = vmul.f32 1.442695, %v76_v32  ;;  %v106_v39 = vsel %vm93_vm11, %v76_v32, 0.0 }
 0x189   :  { %v107_v40 = vsel %vm72_vm5, %v106_v39, 0.0 }
 0x18a   :  { %171 = vpow2.f32 %v94_v33 }
 0x18b   :  { %173 = vrcp.f32 %v119_v41 }
 0x190   :  { %v172_v36 = vpop.eup %171 }
 0x191   :  { %v96_v37 = vsel %vm84_vm8, 0.0, %v172_v36  ;;  %v174_v42 = vpop.eup %173 }
 0x192   :  { %v97_v38 = vsel %vm72_vm5, %v96_v37, 0.0  ;;  %v121_v43 = vmul.f32 %v174_v42, %v119_v41  ;;  %vm126_vm13 = vweird.f32 %v174_v42 }
 0x193   :  { %98 = vadd.xlane.f32.xlu2 %v97_v38  ;;  %vm127_vm14 = vmor %vm125_vm12, %vm126_vm13 }
 0x194   :  { %v122_v44 = vsub.f32 1.0, %v121_v43 }
 0x196   :  { %v123_v46 = vmul.f32 %v174_v42, %v122_v44 }
 0x198   :  { %v124_v48 = vadd.f32 %v174_v42, %v123_v46 }
 0x19a   :  { %v128_v54 = vsel %vm127_vm14, %v174_v42, %v124_v48 }
 0x19b   :  { %108 = vadd.xlane.f32.xlu2 %v107_v40  ;;  %v133_v57 = vsel %vm130_vm15, %v132_v52, %v128_v54 }
 0x206   :  { %v99_v45 = vpop.xlane.xlu2 %98 }
 0x207   :  { %175 = vlog2.f32 %v99_v45 }
 0x20d   :  { %v176_v50 = vpop.eup %175 }
 0x20e   :  { %v111_v51 = vmul.f32 0.6931472, %v176_v50  ;;  %v109_v55 = vpop.xlane.xlu2 %108 }
 0x210   :  { %v112_v53 = vmul.f32 %v159_v28, %v111_v51 }
 0x212   :  { %v113_v56 = vsub.f32 %v109_v55, %v112_v53 }
 0x214   :  { %v134_v58 = vmul.f32 %v133_v57, %v113_v56 }
 0x216   :  { %v135_v59 = vsub.f32 0.0, %v134_v58 }
 0x218   :  { %v136_v60 = vmul.f32 %v160_v29, %v135_v59 }
 0x21a   :  { %v137_v61 = vmul.f32 0.5, %v136_v60 }
 0x21c   :  { %139 = vst.msk [vmem:[%s248_s4] sm:$0xff] %vm138_vm6, %v137_v61 }

</bundles_post_ra>
